<compile_context>
chip_gen: v7x
topology: tpu7x:2x2x1
jax: 0.10.0
libtpu: 0.0.40
codegen_flags: <defaults>
</compile_context>

<pallas_src>
import jax
import jax.numpy as jnp
from jax.experimental import pallas as pl
from jax.experimental.pallas import tpu as pltpu


# ----------------------------------------------------------------------------
# Fused kernel: one batch tile  ->  logits = (x @ enc_w) @ cls_w_t + b
# ----------------------------------------------------------------------------
def _fused_probe_kernel(x_ref, enc_w_ref, cls_w_ref, b_ref, o_ref):
    # x_ref:     [TB, K_flat]            bf16  (pipelined per grid step)
    # enc_w_ref: [K_flat, proj_dim]      bf16  (resident across grid)
    # cls_w_ref: [proj_dim, N_pad=128]   bf16  (resident across grid)
    # b_ref:     [1, num_classes]        f32   (resident across grid)
    # o_ref:     [TB, num_classes]       f32   (narrow writeback)
    z = jnp.dot(x_ref[...], enc_w_ref[...], preferred_element_type=jnp.float32)
    logits = jnp.dot(z.astype(jnp.bfloat16), cls_w_ref[...],
                     preferred_element_type=jnp.float32)
    n = o_ref.shape[-1]
    o_ref[...] = logits[:, :n] + b_ref[...]


def linear_probe_forward(x, enc_w, cls_w, cls_b, *, batch_tile=2048):
    """x: [B, C, H, W] f32; enc_w: [C*H*W, proj_dim] (frozen encoder stand-in);
    cls_w: [num_classes, proj_dim] (PyTorch nn.Linear layout); cls_b: [num_classes].
    Returns logits [B, num_classes] f32.

    Forward-only kernel; torch.no_grad() on the encoder does not change the
    forward value (it only matters for gradients, which this kernel does not define).
    Inputs/weights are streamed as bf16 with f32 accumulation (mem-bound regime).
    """
    ALIGN = 16  # bf16 sublane packing: batch tile rows must be a multiple of 16

    B = x.shape[0]
    x_flat = x.reshape(B, -1).astype(jnp.bfloat16)
    k_flat = x_flat.shape[1]
    proj_dim = enc_w.shape[1]
    num_classes = cls_w.shape[0]

    # Frozen weights: transpose + zero-pad the classifier weight to 128 lanes once in
    # the wrapper (MXU-friendly); padded columns are zero and are sliced away in-kernel.
    n_pad = 128 * pl.cdiv(num_classes, 128)
    cls_w_t = (jnp.zeros((proj_dim, n_pad), jnp.bfloat16)
               .at[:, :num_classes].set(cls_w.T.astype(jnp.bfloat16)))
    enc_w_bf = enc_w.astype(jnp.bfloat16)
    bias = cls_b.reshape(1, num_classes).astype(jnp.float32)

    # Batch rows aligned to 16. Only non-16-aligned batches pay a (<=15-row) pad copy;
    # typical power-of-two batches skip it entirely.
    if B % ALIGN == 0:
        b_rows = B
    else:
        b_rows = ALIGN * pl.cdiv(B, ALIGN)
        x_flat = jnp.pad(x_flat, ((0, b_rows - B), (0, 0)))

    # VMEM guardrail (v7x: 32 MiB scoped default / 64 MiB physical): the two
    # double-buffered bf16 x tiles are the big consumer; keep 2 * tb * k_flat * 2B
    # under ~16 MiB. Re-derive (and set vmem_limit_bytes) if K_flat grows a lot.
    max_tb_vmem = max(ALIGN, ((8 * 1024 * 1024) // (2 * k_flat)) // ALIGN * ALIGN)

    cap = min(batch_tile, max_tb_vmem, b_rows)
    # v7x: keep >= 2 grid blocks when possible so ("parallel",) shards the batch
    # across both TensorCores (each has its own HBM path). No-op on v5e/v6e.
    if b_rows >= 2 * ALIGN:
        cap = min(cap, max(ALIGN, b_rows // 2))
    cap = max(ALIGN, (cap // ALIGN) * ALIGN)
    tb = cap
    while b_rows % tb != 0:      # largest multiple of 16 <= cap that divides b_rows
        tb -= ALIGN

    out = pl.pallas_call(
        _fused_probe_kernel,
        out_shape=jax.ShapeDtypeStruct((b_rows, num_classes), jnp.float32),
        grid=(b_rows // tb,),
        in_specs=[
            pl.BlockSpec((tb, k_flat), lambda i: (i, 0)),          # x tile (pipelined)
            pl.BlockSpec((k_flat, proj_dim), lambda i: (0, 0)),    # enc_w (resident)
            pl.BlockSpec((proj_dim, n_pad), lambda i: (0, 0)),     # cls_w^T padded (resident)
            pl.BlockSpec((1, num_classes), lambda i: (0, 0)),      # bias (resident)
        ],
        out_specs=pl.BlockSpec((tb, num_classes), lambda i: (i, 0)),
        compiler_params=pltpu.CompilerParams(
            # Independent batch blocks -> shard across both TensorCores on v7x.
            dimension_semantics=("parallel",),
        ),
    )(x_flat, enc_w_bf, cls_w_t, bias)

    # Drop batch padding (if any).
    return out[:B]


if __name__ == "__main__":
    B, C, H, W = 2, 1, 16, 16            # small MNIST-like NCHW input
    proj_dim, num_classes = 32, 10

    key = jax.random.PRNGKey(0)
    kx, ke, kw, kb = jax.random.split(key, 4)

    x = jax.random.normal(kx, (B, C, H, W), dtype=jnp.float32)

    # TODO(synk): the real pretrained `encoder` module is opaque / not specified;
    # substituted with a deterministic frozen linear projection flatten(NCHW)->proj_dim.
    enc_w = jax.random.normal(ke, (C * H * W, proj_dim), dtype=jnp.float32) * 0.05
    # nn.Linear(proj_dim, num_classes): weight [num_classes, proj_dim], bias [num_classes]
    cls_w = jax.random.normal(kw, (num_classes, proj_dim), dtype=jnp.float32) * 0.1
    cls_b = jax.random.normal(kb, (num_classes,), dtype=jnp.float32) * 0.1

    logits = linear_probe_forward(x, enc_w, cls_w, cls_b)
    logits = jax.block_until_ready(logits)
    assert logits.shape == (B, num_classes)

    # Reference 1: bf16-consistent path (same rounding as the kernel, f32 accumulate).
    x_bf = x.reshape(B, -1).astype(jnp.bfloat16)
    z_bf = jnp.dot(x_bf, enc_w.astype(jnp.bfloat16), preferred_element_type=jnp.float32)
    ref_bf = jnp.dot(z_bf.astype(jnp.bfloat16), cls_w.astype(jnp.bfloat16).T,
                     preferred_element_type=jnp.float32) + cls_b
    assert jnp.allclose(logits, ref_bf, atol=5e-3, rtol=5e-3), \
        float(jnp.max(jnp.abs(logits - ref_bf)))

    # Reference 2: full-f32 PyTorch-parity path (looser tolerance due to bf16 inputs).
    z32 = jax.lax.stop_gradient(x.reshape(B, -1) @ enc_w)
    ref32 = z32 @ cls_w.T + cls_b
    assert jnp.allclose(logits, ref32, atol=5e-2, rtol=5e-2), \
        float(jnp.max(jnp.abs(logits - ref32)))

    print("KERNEL_OK")
</pallas_src>

<mosaic_0001>
module attributes {stable_mosaic.version = 11 : i64} {
  func.func @_fused_probe_kernel(%arg0: i32, %arg1: memref<16x256xbf16, #tpu.memory_space<vmem>>, %arg2: memref<256x32xbf16, #tpu.memory_space<vmem>>, %arg3: memref<32x128xbf16, #tpu.memory_space<vmem>>, %arg4: memref<1x10xf32, #tpu.memory_space<vmem>>, %arg5: memref<16x10xf32, #tpu.memory_space<vmem>>) attributes {dimension_semantics = [#tpu.dimension_semantics<parallel>], iteration_bounds = array<i64: 1>, scalar_prefetch = 0 : i64, scratch_operands = 0 : i64, tpu.core_type = #tpu.core_type<tc>, window_params = [{transform_indices = @transform_0, window_bounds = array<i64: 16, 256>}, {pipeline_mode = #tpu.pipeline_mode<synchronous>, transform_indices = @transform_1, window_bounds = array<i64: 256, 32>}, {pipeline_mode = #tpu.pipeline_mode<synchronous>, transform_indices = @transform_2, window_bounds = array<i64: 32, 128>}, {pipeline_mode = #tpu.pipeline_mode<synchronous>, transform_indices = @transform_3, window_bounds = array<i64: 1, 10>}, {transform_indices = @transform_4, window_bounds = array<i64: 16, 10>}]} {
    %c0 = arith.constant 0 : index
    %c0_0 = arith.constant 0 : index
    %0 = vector.load %arg1[%c0, %c0_0] : memref<16x256xbf16, #tpu.memory_space<vmem>>, vector<16x256xbf16>
    %c0_1 = arith.constant 0 : index
    %c0_2 = arith.constant 0 : index
    %1 = vector.load %arg2[%c0_1, %c0_2] : memref<256x32xbf16, #tpu.memory_space<vmem>>, vector<256x32xbf16>
    %cst = arith.constant dense<0.000000e+00> : vector<16x32xf32>
    %2 = tpu.matmul %0, %1, %cst {dimension_numbers = #tpu.dot_dimension_numbers<[1], [0], [0], [1], [0, 0, 1, 1], [], []>} : vector<16x256xbf16>, vector<256x32xbf16>, vector<16x32xf32> -> vector<16x32xf32>
    %3 = arith.truncf %2 : vector<16x32xf32> to vector<16x32xbf16>
    %c0_3 = arith.constant 0 : index
    %c0_4 = arith.constant 0 : index
    %4 = vector.load %arg3[%c0_3, %c0_4] : memref<32x128xbf16, #tpu.memory_space<vmem>>, vector<32x128xbf16>
    %cst_5 = arith.constant dense<0.000000e+00> : vector<16x128xf32>
    %5 = tpu.matmul %3, %4, %cst_5 {dimension_numbers = #tpu.dot_dimension_numbers<[1], [0], [0], [1], [0, 0, 1, 1], [], []>} : vector<16x32xbf16>, vector<32x128xbf16>, vector<16x128xf32> -> vector<16x128xf32>
    %6 = vector.extract_strided_slice %5 {offsets = [0, 0], sizes = [16, 10], strides = [1, 1]} : vector<16x128xf32> to vector<16x10xf32>
    %c0_6 = arith.constant 0 : index
    %c0_7 = arith.constant 0 : index
    %7 = vector.load %arg4[%c0_6, %c0_7] : memref<1x10xf32, #tpu.memory_space<vmem>>, vector<1x10xf32>
    %8 = vector.broadcast %7 : vector<1x10xf32> to vector<16x10xf32>
    %9 = arith.addf %6, %8 : vector<16x10xf32>
    %c0_8 = arith.constant 0 : index
    %c0_9 = arith.constant 0 : index
    %10 = vector.load %arg5[%c0_8, %c0_9] : memref<16x10xf32, #tpu.memory_space<vmem>>, vector<16x10xf32>
    tpu.vector_store %arg5[%c0_8, %c0_9], %9 {strides = array<i32>} : memref<16x10xf32, #tpu.memory_space<vmem>>, vector<16x10xf32>,
    return
  }
  func.func @transform_0(%arg0: i32) -> (i32, i32) {
    %c0_i32 = arith.constant 0 : i32
    %c0_i32_0 = arith.constant 0 : i32
    return %arg0, %c0_i32 : i32, i32
  }
  func.func @transform_1(%arg0: i32) -> (i32, i32) {
    %c0_i32 = arith.constant 0 : i32
    %c0_i32_0 = arith.constant 0 : i32
    %c0_i32_1 = arith.constant 0 : i32
    return %c0_i32, %c0_i32_0 : i32, i32
  }
  func.func @transform_2(%arg0: i32) -> (i32, i32) {
    %c0_i32 = arith.constant 0 : i32
    %c0_i32_0 = arith.constant 0 : i32
    %c0_i32_1 = arith.constant 0 : i32
    return %c0_i32, %c0_i32_0 : i32, i32
  }
  func.func @transform_3(%arg0: i32) -> (i32, i32) {
    %c0_i32 = arith.constant 0 : i32
    %c0_i32_0 = arith.constant 0 : i32
    %c0_i32_1 = arith.constant 0 : i32
    return %c0_i32, %c0_i32_0 : i32, i32
  }
  func.func @transform_4(%arg0: i32) -> (i32, i32) {
    %c0_i32 = arith.constant 0 : i32
    %c0_i32_0 = arith.constant 0 : i32
    return %arg0, %c0_i32 : i32, i32
  }
}

</mosaic_0001>

<bundles_post_ra>
// kernel: tpu_custom_call.1
= control target key start
LH: loop header
LB: loop body
LE: loop exit
PB: predicated region body
PF: predicated region fallthrough
CT: control target
= control target key end

     0   :  { %s500_s0 = inlined_call_operand.vmem [shape: bf16[16,256], index: 0, kind: input, shape index: {}]   ;;  %s501_s1 = inlined_call_operand.vmem [shape: bf16[256,32], index: 1, kind: input, shape index: {}]   ;;  %s502_s2 = inlined_call_operand.vmem [shape: bf16[32,128], index: 2, kind: input, shape index: {}]   ;;  %s503_s3 = inlined_call_operand.vmem [shape: f32[1,10], index: 3, kind: input, shape index: {}]   ;;  %s504_s4 = inlined_call_operand.hbm [shape: f32[16,10], index: 4, kind: output, shape index: {}]  }
   0x1   :  { %v350_v0 = vld [vmem:[%s501_s1 + $0x40] sm:$0xff]   ;;  %v352_v2 = vld [vmem:[%s501_s1 + $0x48] sm:$0xff]   ;;  %v354_v4 = vld [vmem:[%s501_s1 + $0x50] sm:$0xff]  }
   0x2   :  { %v351_v1 = vld [vmem:[%s501_s1] sm:$0xff]   ;;  %312 = vmatprep.subr.bf16.mxu0 %v350_v0  ;;  %v353_v3 = vld [vmem:[%s501_s1 + $0x8] sm:$0xff]   ;;  %v355_v5 = vld [vmem:[%s501_s1 + $0x10] sm:$0xff]  }
   0x3   :  { %313 = vmatpush3.bf16.msra.mxu0 %v351_v1  ;;  %v356_v6 = vld [vmem:[%s501_s1 + $0x58] sm:$0xff]   ;;  %v358_v8 = vld [vmem:[%s501_s1 + $0x60] sm:$0xff]   ;;  %v360_v10 = vld [vmem:[%s501_s1 + $0x68] sm:$0xff]  }
   0x4   :  { %314 = vmatprep.subr.bf16.mxu0 %v352_v2  ;;  %v357_v7 = vld [vmem:[%s501_s1 + $0x18] sm:$0xff]   ;;  %v359_v9 = vld [vmem:[%s501_s1 + $0x20] sm:$0xff]  }
   0x5   :  { %v368_v11 = vld [vmem:[%s500_s0 + $0x4] ss:$8 sps:$4 sm:$0xff]  }
   0x7   :  { %315 = vmatpush3.bf16.msra.mxu0 %v353_v3 }
   0x8   :  { %316 = vmatprep.subr.bf16.mxu0 %v354_v4 }
   0xb   :  { %317 = vmatpush3.bf16.msra.mxu0 %v355_v5 }
   0xc   :  { %318 = vmatprep.subr.bf16.mxu0 %v356_v6 }
   0xf   :  { %319 = vmatpush3.bf16.msra.mxu0 %v357_v7 }
  0x10   :  { %320 = vmatprep.subr.bf16.mxu0 %v358_v8 }
  0x11   :  { %9 = vsyncpa [#allocation3], 0  ;;  %v361_v12 = vld [vmem:[%s501_s1 + $0x28] sm:$0xff]   ;;  %191 = vmatprep.mubr.bf16.mxu0 %v368_v11  ;;  %v362_v13 = vld [vmem:[%s501_s1 + $0x70] sm:$0xff]   ;;  %v395_v19 = vmov 0.0   ;;  %vm396_vm0 = vmmov 0  }
  0x12   :  { %v363_v14 = vld [vmem:[%s501_s1 + $0x30] sm:$0xff]   ;;  %v364_v15 = vld [vmem:[%s501_s1 + $0x78] sm:$0xff]   ;;  %v366_v17 = vld [vmem:[%s500_s0] ss:$8 sps:$4 sm:$0xff]   ;;  %337 = vmatprep.subr.bf16.mxu1 %v395_v19  ;;  %341 = vmatprep.mubr.msk.bf16.mxu1 %vm396_vm0, %v395_v19  ;;  %vm217_vm1 = vcmask 261120   ;;  %s397_s29 = smov [#allocation2]  }
  0x13   :  { %321 = vmatpush3.bf16.msra.mxu0 %v359_v9  ;;  %v365_v16 = vld [vmem:[%s501_s1 + $0x38] sm:$0xff]   ;;  %v369_v18 = vld [vmem:[%s502_s2] sm:$0xff]   ;;  %v370_v20 = vld [vmem:[%s502_s2 + $0x8] sm:$0xff]   ;;  %s279_s30 = sshll.u32 %s397_s29, 4  ;;  %vm271_vm2 = vcmask 80896   ;;  %s280_s30 = int_to_ptr.vmem [resolvable:$true] %s279_s30 }
  0x14   :  { %322 = vmatprep.subr.bf16.mxu0 %v360_v10  ;;  %338 = vmatpush3.bf16.msra.mxu1 %v369_v18  ;;  %v311_v28 = vld [vmem:[%s503_s3] ss:$0 sm:$0xff]  ;;  %s371_s2 = scalar_lea.vmem %s280_s30, 256  ;;  %p376_p1 = scmp.lt.s32.totalorder %s280_s30, %s280_s30 }
  0x15   :  { %339 = vmatprep.subr.bf16.mxu1 %v395_v19  ;;  %p372_p0 = scmp.ne.s32.totalorder %s280_s30, %s371_s2  ;;  %p377_p2 = scmp.lt.s32.totalorder %s371_s2, %s371_s2 }
  0x17   :  { %323 = vmatpush3.bf16.msra.mxu0 %v361_v12  ;;  %p378_p3 = por %p377_p2, %p376_p1 }
  0x18   :  { %324 = vmatprep.subr.bf16.mxu0 %v362_v13  ;;  %340 = vmatpush3.bf16.msra.mxu1 %v370_v20 }
  0x19   :  { %p379_p4 = pnand %p378_p3, %p372_p0 }
  0x1b   :  { %325 = vmatpush3.bf16.msra.mxu0 %v363_v14 }
  0x1c   :  { %326 = vmatprep.subr.bf16.mxu0 %v364_v15 }
  0x1f   :  { %327 = vmatpush3.bf16.msra.mxu0 %v365_v16 }
  0x22   :  { %192 = vmatmul.mubr.bf16.vlgmr.msra.gmra.mrb[0].mxu0 %v366_v17 }
  0xf5   :  { %v328_v21 = vpop.f32.mrb[0].mxu0 }
  0xf6   :  { %v329_v22 = vpop.f32.mrb[1].mxu0 }
  0xf7   :  { %v330_v23 = vadd.f32 %v329_v22, %v328_v21  ;;  %v331_v24 = vpop.f32.mrb[2].mxu0 }
  0xf8   :  { %v332_v25 = vpop.f32.mrb[3].mxu0 }
  0xf9   :  { %v333_v26 = vadd.f32 %v332_v25, %v331_v24 }
  0xfb   :  { %v200_v27 = vpack.c.bf16 %v333_v26, %v330_v23 }
  0xfd   :  { %342 = vmatmul.mubr.msk.bf16.vlgmr.msra.gmra.mrb[0].mxu1 %vm217_vm1, %v200_v27 }
 0x1d0   :  { %v255_v29 = vpop.f32.mrb[0].mxu1 }
 0x1d1   :  { %v269_v30 = vadd.f32 %v311_v28, %v255_v29  ;;  %v343_v31 = vpop.f32.mrb[1].mxu1 }
 0x1d2   :  { %v258_v32 = vpop.f32.mrb[2].mxu1 }
 0x1d3   :  { %272 = vst.msk [vmem:[#allocation2] sm:$0xff] %vm271_vm2, %v269_v30  ;;  %v270_v33 = vadd.f32 %v311_v28, %v258_v32  ;;  %v344_v34 = vpop.f32.mrb[3].mxu1 }
 0x1d5   :  { %273 = vst.msk [vmem:[#allocation2 + $0x8] sm:$0xff] %vm271_vm2, %v270_v33 }
 0x1d6   :  { %382 = shalt.err (!%p379_p4)
}
 0x1d7   :  { %s383_s6 = scalar_lea.hbm %s504_s4, 256 }
 0x1d8   :  { %p384_p5 = scmp.ne.s32.totalorder %s504_s4, %s383_s6  ;;  %p387_p6 = scmp.lt.u32.totalorder %s383_s6, %s504_s4 }
 0x1da   :  { %p389_p7 = pnand %p387_p6, %p384_p5 }
 0x1dc   :  { %392 = shalt.err (!%p389_p7)
}
 0x1dd   :  { %s398_s11 = smov 128   ;;  %s399_s12 = smov 8  }
 0x1de   :  { %285 = dma.vmem_to_hbm [thread:$0]  %s280_s30, 256, %s504_s4, [#allocation3], %s398_s11, %s398_s11, %s399_s12  }
 0x1df   :  { %393 = dma.done.wait [#allocation3], 256  }
 0x1e0   :  { %394 = vsyncadd [#allocation3], 4294967040 }
 0x1e1   :  { %289 = vsyncpa [#allocation3], 1 }

</bundles_post_ra>
